<compile_context>
chip_gen: v7x
topology: tpu7x:2x2x1
jax: 0.10.0
libtpu: 0.0.40
codegen_flags: <defaults>
</compile_context>

<pallas_src>
import functools

import jax
import jax.numpy as jnp
from jax.experimental import pallas as pl
from jax.experimental.pallas import tpu as pltpu


def _complex_conv2d_kernel(x_ref, w_ref, b_ref, y_ref, *, KH, KW, W, TILE):
    """One batch image: fused complex conv via per-tap block matmuls."""
    Mout = y_ref.shape[1]
    C2out = y_ref.shape[2]
    bias = b_ref[...]                                     # (1, 2*Cout) f32

    # Static chunk loop over output rows; all accumulation stays in registers,
    # exactly one store per chunk (no read-modify-write through y_ref).
    for start in range(0, Mout, TILE):
        size = min(TILE, Mout - start)
        acc = jnp.zeros((size, C2out), jnp.float32) + bias
        for kh in range(KH):
            for kw in range(KW):
                off = start + kh * W + kw
                a = x_ref[0, off:off + size, :]           # (size, 2*Cin) bf16
                wt = w_ref[kh * KW + kw]                  # (2*Cin, 2*Cout) bf16
                acc = acc + jnp.dot(a, wt,
                                    preferred_element_type=jnp.float32)
        y_ref[0, start:start + size, :] = acc


def complex_conv2d(x, w_r, w_i, b_r, b_i, *, stride=1, padding=0,
                   dilation=1, groups=1):
    """JAX/Pallas equivalent of complexPyTorch ComplexConv2d.forward."""
    if stride != 1 or dilation != 1 or groups != 1:
        raise NotImplementedError("only stride=1, dilation=1, groups=1 supported")

    N, Cin, H, W = x.shape
    Cout, _, KH, KW = w_r.shape

    # Real/imag channel-concatenated planes -> pad -> channels-last, flat spatial.
    x_cat = jnp.concatenate(
        [jnp.real(x).astype(jnp.float32), jnp.imag(x).astype(jnp.float32)],
        axis=1)                                           # (N, 2*Cin, H, W)
    if padding:
        x_cat = jnp.pad(x_cat, ((0, 0), (0, 0),
                                (padding, padding), (padding, padding)))
        H += 2 * padding
        W += 2 * padding
    x_cat = jnp.transpose(x_cat, (0, 2, 3, 1)).reshape(N, H * W, 2 * Cin)
    x_cat = x_cat.astype(jnp.bfloat16)

    OH = H - KH + 1
    OW = W - KW + 1
    Mout = (OH - 1) * W + OW          # flattened output rows actually computed

    # Per-tap 2x2 complex block weights: (KH*KW, 2*Cin, 2*Cout).
    wr_k = jnp.transpose(w_r, (2, 3, 1, 0)).reshape(KH * KW, Cin, Cout)
    wi_k = jnp.transpose(w_i, (2, 3, 1, 0)).reshape(KH * KW, Cin, Cout)
    wr_k = wr_k.astype(jnp.float32)
    wi_k = wi_k.astype(jnp.float32)
    w_blk = jnp.concatenate(
        [jnp.concatenate([wr_k, wi_k], axis=2),
         jnp.concatenate([-wi_k, wr_k], axis=2)], axis=1
    ).astype(jnp.bfloat16)                                # (KH*KW, 2*Cin, 2*Cout)
    # Pre-combined biases: real plane gets (b_r - b_i), imag plane (b_r + b_i).
    b_cat = jnp.concatenate([b_r - b_i, b_r + b_i]).reshape(1, 2 * Cout)
    b_cat = b_cat.astype(jnp.float32)

    TILE = 512   # output-row chunk (multiple of 8); register-accumulated

    kernel = functools.partial(_complex_conv2d_kernel,
                               KH=KH, KW=KW, W=W, TILE=TILE)

    grid_spec = pltpu.PrefetchScalarGridSpec(
        num_scalar_prefetch=0,
        grid=(N,),
        in_specs=[
            pl.BlockSpec((1, H * W, 2 * Cin), lambda n: (n, 0, 0)),
            pl.BlockSpec((KH * KW, 2 * Cin, 2 * Cout), lambda n: (0, 0, 0)),
            pl.BlockSpec((1, 2 * Cout), lambda n: (0, 0)),
        ],
        out_specs=pl.BlockSpec((1, Mout, 2 * Cout), lambda n: (n, 0, 0)),
    )

    y = pl.pallas_call(
        kernel,
        out_shape=jax.ShapeDtypeStruct((N, Mout, 2 * Cout), jnp.float32),
        grid_spec=grid_spec,
        compiler_params=pltpu.CompilerParams(
            dimension_semantics=("parallel",),
            vmem_limit_bytes=32 * 1024 * 1024),
    )(x_cat, w_blk, b_cat)

    # (N, Mout, 2*Cout) -> (N, 2*Cout, OH, OW), then split re/im once.
    tail = OH * W - Mout                # = KW - 1 junk columns per output row
    if tail:
        y = jnp.pad(y, ((0, 0), (0, tail), (0, 0)))
    y = y.reshape(N, OH, W, 2 * Cout)[:, :, :OW, :]
    y = jnp.transpose(y, (0, 3, 1, 2))                    # (N, 2*Cout, OH, OW)
    return jax.lax.complex(y[:, :Cout], y[:, Cout:])


class ComplexConv2d:
    """Mirror of complexPyTorch ComplexConv2d (two real Conv2d, complex combine)."""

    def __init__(self, in_channels, out_channels, kernel_size=3, stride=1,
                 padding=0, dilation=1, groups=1, bias=True, *, key=None):
        if key is None:
            key = jax.random.PRNGKey(0)
        self.stride = stride
        self.padding = padding
        self.dilation = dilation
        self.groups = groups
        k = ((kernel_size, kernel_size) if isinstance(kernel_size, int)
             else tuple(kernel_size))
        fan_in = in_channels * k[0] * k[1]
        bound = 1.0 / (fan_in ** 0.5)
        kwr, kwi, kbr, kbi = jax.random.split(key, 4)
        wshape = (out_channels, in_channels, k[0], k[1])
        self.w_r = jax.random.uniform(kwr, wshape, jnp.float32, -bound, bound)
        self.w_i = jax.random.uniform(kwi, wshape, jnp.float32, -bound, bound)
        if bias:
            self.b_r = jax.random.uniform(kbr, (out_channels,), jnp.float32, -bound, bound)
            self.b_i = jax.random.uniform(kbi, (out_channels,), jnp.float32, -bound, bound)
        else:
            self.b_r = jnp.zeros((out_channels,), jnp.float32)
            self.b_i = jnp.zeros((out_channels,), jnp.float32)

    def __call__(self, x):
        return complex_conv2d(x, self.w_r, self.w_i, self.b_r, self.b_i,
                              stride=self.stride, padding=self.padding,
                              dilation=self.dilation, groups=self.groups)


if __name__ == "__main__":
    key = jax.random.PRNGKey(0)
    kx_r, kx_i, kmod = jax.random.split(key, 3)
    N, Cin, H, W = 2, 4, 16, 16
    Cout, K = 4, 3

    x_r = jax.random.normal(kx_r, (N, Cin, H, W), jnp.float32)
    x_i = jax.random.normal(kx_i, (N, Cin, H, W), jnp.float32)
    x = jax.lax.complex(x_r, x_i)                         # complex64, NCHW

    conv = ComplexConv2d(Cin, Cout, kernel_size=K, key=kmod)
    y = jax.block_until_ready(conv(x))

    assert y.shape == (N, Cout, H - K + 1, W - K + 1)
    assert y.dtype == jnp.complex64

    # Reference: apply_complex with XLA's conv at matched (bf16-input, fp32-
    # accumulate) precision — same semantics as torch Conv2d.
    def bf16(v):
        return v.astype(jnp.bfloat16).astype(jnp.float32)

    def conv_ref(inp, w, b):
        out = jax.lax.conv_general_dilated(
            bf16(inp), bf16(w), window_strides=(1, 1), padding="VALID",
            dimension_numbers=("NCHW", "OIHW", "NCHW"),
            precision=jax.lax.Precision.HIGHEST)
        return out + b.reshape(1, -1, 1, 1)

    ref_r = conv_ref(x_r, conv.w_r, conv.b_r) - conv_ref(x_i, conv.w_i, conv.b_i)
    ref_i = conv_ref(x_i, conv.w_r, conv.b_r) + conv_ref(x_r, conv.w_i, conv.b_i)

    err_r = float(jnp.max(jnp.abs(jnp.real(y) - ref_r)))
    err_i = float(jnp.max(jnp.abs(jnp.imag(y) - ref_i)))
    assert err_r < 2e-3 and err_i < 2e-3, (err_r, err_i)

    print("KERNEL_OK")
</pallas_src>

<mosaic_0001>
module attributes {stable_mosaic.version = 11 : i64} {
  func.func @_complex_conv2d_kernel(%arg0: i32, %arg1: memref<1x256x8xbf16, #tpu.memory_space<vmem>>, %arg2: memref<9x8x8xbf16, #tpu.memory_space<vmem>>, %arg3: memref<1x8xf32, #tpu.memory_space<vmem>>, %arg4: memref<1x222x8xf32, #tpu.memory_space<vmem>>) attributes {dimension_semantics = [#tpu.dimension_semantics<parallel>], iteration_bounds = array<i64: 2>, scalar_prefetch = 0 : i64, scratch_operands = 0 : i64, tpu.core_type = #tpu.core_type<tc>, window_params = [{transform_indices = @transform_0, window_bounds = array<i64: 1, 256, 8>}, {pipeline_mode = #tpu.pipeline_mode<synchronous>, transform_indices = @transform_1, window_bounds = array<i64: 9, 8, 8>}, {pipeline_mode = #tpu.pipeline_mode<synchronous>, transform_indices = @transform_2, window_bounds = array<i64: 1, 8>}, {transform_indices = @transform_3, window_bounds = array<i64: 1, 222, 8>}]} {
    %c0 = arith.constant 0 : index
    %c0_0 = arith.constant 0 : index
    %0 = vector.load %arg3[%c0, %c0_0] : memref<1x8xf32, #tpu.memory_space<vmem>>, vector<1x8xf32>
    %cst = arith.constant 0.000000e+00 : f32
    %1 = vector.broadcast %cst : f32 to vector<222x8xf32>
    %2 = vector.broadcast %0 : vector<1x8xf32> to vector<222x8xf32>
    %3 = arith.addf %1, %2 : vector<222x8xf32>
    %c0_1 = arith.constant 0 : index
    %c0_2 = arith.constant 0 : index
    %c0_3 = arith.constant 0 : index
    %4 = vector.load %arg1[%c0_1, %c0_2, %c0_3] : memref<1x256x8xbf16, #tpu.memory_space<vmem>>, vector<1x222x8xbf16>
    %5 = vector.shape_cast %4 : vector<1x222x8xbf16> to vector<222x8xbf16>
    %c0_4 = arith.constant 0 : index
    %c0_5 = arith.constant 0 : index
    %c0_6 = arith.constant 0 : index
    %6 = vector.load %arg2[%c0_4, %c0_5, %c0_6] : memref<9x8x8xbf16, #tpu.memory_space<vmem>>, vector<1x8x8xbf16>
    %7 = vector.shape_cast %6 : vector<1x8x8xbf16> to vector<8x8xbf16>
    %cst_7 = arith.constant dense<0.000000e+00> : vector<222x8xf32>
    %8 = tpu.matmul %5, %7, %cst_7 {dimension_numbers = #tpu.dot_dimension_numbers<[1], [0], [0], [1], [0, 0, 1, 1], [], []>} : vector<222x8xbf16>, vector<8x8xbf16>, vector<222x8xf32> -> vector<222x8xf32>
    %9 = arith.addf %3, %8 : vector<222x8xf32>
    %c0_8 = arith.constant 0 : index
    %c1 = arith.constant 1 : index
    %c0_9 = arith.constant 0 : index
    %10 = vector.load %arg1[%c0_8, %c1, %c0_9] : memref<1x256x8xbf16, #tpu.memory_space<vmem>>, vector<1x222x8xbf16>
    %11 = vector.shape_cast %10 : vector<1x222x8xbf16> to vector<222x8xbf16>
    %c1_10 = arith.constant 1 : index
    %c0_11 = arith.constant 0 : index
    %c0_12 = arith.constant 0 : index
    %12 = vector.load %arg2[%c1_10, %c0_11, %c0_12] : memref<9x8x8xbf16, #tpu.memory_space<vmem>>, vector<1x8x8xbf16>
    %13 = vector.shape_cast %12 : vector<1x8x8xbf16> to vector<8x8xbf16>
    %cst_13 = arith.constant dense<0.000000e+00> : vector<222x8xf32>
    %14 = tpu.matmul %11, %13, %cst_13 {dimension_numbers = #tpu.dot_dimension_numbers<[1], [0], [0], [1], [0, 0, 1, 1], [], []>} : vector<222x8xbf16>, vector<8x8xbf16>, vector<222x8xf32> -> vector<222x8xf32>
    %15 = arith.addf %9, %14 : vector<222x8xf32>
    %c0_14 = arith.constant 0 : index
    %c2 = arith.constant 2 : index
    %c0_15 = arith.constant 0 : index
    %16 = vector.load %arg1[%c0_14, %c2, %c0_15] : memref<1x256x8xbf16, #tpu.memory_space<vmem>>, vector<1x222x8xbf16>
    %17 = vector.shape_cast %16 : vector<1x222x8xbf16> to vector<222x8xbf16>
    %c2_16 = arith.constant 2 : index
    %c0_17 = arith.constant 0 : index
    %c0_18 = arith.constant 0 : index
    %18 = vector.load %arg2[%c2_16, %c0_17, %c0_18] : memref<9x8x8xbf16, #tpu.memory_space<vmem>>, vector<1x8x8xbf16>
    %19 = vector.shape_cast %18 : vector<1x8x8xbf16> to vector<8x8xbf16>
    %cst_19 = arith.constant dense<0.000000e+00> : vector<222x8xf32>
    %20 = tpu.matmul %17, %19, %cst_19 {dimension_numbers = #tpu.dot_dimension_numbers<[1], [0], [0], [1], [0, 0, 1, 1], [], []>} : vector<222x8xbf16>, vector<8x8xbf16>, vector<222x8xf32> -> vector<222x8xf32>
    %21 = arith.addf %15, %20 : vector<222x8xf32>
    %c0_20 = arith.constant 0 : index
    %c16 = arith.constant 16 : index
    %c0_21 = arith.constant 0 : index
    %22 = vector.load %arg1[%c0_20, %c16, %c0_21] : memref<1x256x8xbf16, #tpu.memory_space<vmem>>, vector<1x222x8xbf16>
    %23 = vector.shape_cast %22 : vector<1x222x8xbf16> to vector<222x8xbf16>
    %c3 = arith.constant 3 : index
    %c0_22 = arith.constant 0 : index
    %c0_23 = arith.constant 0 : index
    %24 = vector.load %arg2[%c3, %c0_22, %c0_23] : memref<9x8x8xbf16, #tpu.memory_space<vmem>>, vector<1x8x8xbf16>
    %25 = vector.shape_cast %24 : vector<1x8x8xbf16> to vector<8x8xbf16>
    %cst_24 = arith.constant dense<0.000000e+00> : vector<222x8xf32>
    %26 = tpu.matmul %23, %25, %cst_24 {dimension_numbers = #tpu.dot_dimension_numbers<[1], [0], [0], [1], [0, 0, 1, 1], [], []>} : vector<222x8xbf16>, vector<8x8xbf16>, vector<222x8xf32> -> vector<222x8xf32>
    %27 = arith.addf %21, %26 : vector<222x8xf32>
    %c0_25 = arith.constant 0 : index
    %c17 = arith.constant 17 : index
    %c0_26 = arith.constant 0 : index
    %28 = vector.load %arg1[%c0_25, %c17, %c0_26] : memref<1x256x8xbf16, #tpu.memory_space<vmem>>, vector<1x222x8xbf16>
    %29 = vector.shape_cast %28 : vector<1x222x8xbf16> to vector<222x8xbf16>
    %c4 = arith.constant 4 : index
    %c0_27 = arith.constant 0 : index
    %c0_28 = arith.constant 0 : index
    %30 = vector.load %arg2[%c4, %c0_27, %c0_28] : memref<9x8x8xbf16, #tpu.memory_space<vmem>>, vector<1x8x8xbf16>
    %31 = vector.shape_cast %30 : vector<1x8x8xbf16> to vector<8x8xbf16>
    %cst_29 = arith.constant dense<0.000000e+00> : vector<222x8xf32>
    %32 = tpu.matmul %29, %31, %cst_29 {dimension_numbers = #tpu.dot_dimension_numbers<[1], [0], [0], [1], [0, 0, 1, 1], [], []>} : vector<222x8xbf16>, vector<8x8xbf16>, vector<222x8xf32> -> vector<222x8xf32>
    %33 = arith.addf %27, %32 : vector<222x8xf32>
    %c0_30 = arith.constant 0 : index
    %c18 = arith.constant 18 : index
    %c0_31 = arith.constant 0 : index
    %34 = vector.load %arg1[%c0_30, %c18, %c0_31] : memref<1x256x8xbf16, #tpu.memory_space<vmem>>, vector<1x222x8xbf16>
    %35 = vector.shape_cast %34 : vector<1x222x8xbf16> to vector<222x8xbf16>
    %c5 = arith.constant 5 : index
    %c0_32 = arith.constant 0 : index
    %c0_33 = arith.constant 0 : index
    %36 = vector.load %arg2[%c5, %c0_32, %c0_33] : memref<9x8x8xbf16, #tpu.memory_space<vmem>>, vector<1x8x8xbf16>
    %37 = vector.shape_cast %36 : vector<1x8x8xbf16> to vector<8x8xbf16>
    %cst_34 = arith.constant dense<0.000000e+00> : vector<222x8xf32>
    %38 = tpu.matmul %35, %37, %cst_34 {dimension_numbers = #tpu.dot_dimension_numbers<[1], [0], [0], [1], [0, 0, 1, 1], [], []>} : vector<222x8xbf16>, vector<8x8xbf16>, vector<222x8xf32> -> vector<222x8xf32>
    %39 = arith.addf %33, %38 : vector<222x8xf32>
    %c0_35 = arith.constant 0 : index
    %c32 = arith.constant 32 : index
    %c0_36 = arith.constant 0 : index
    %40 = vector.load %arg1[%c0_35, %c32, %c0_36] : memref<1x256x8xbf16, #tpu.memory_space<vmem>>, vector<1x222x8xbf16>
    %41 = vector.shape_cast %40 : vector<1x222x8xbf16> to vector<222x8xbf16>
    %c6 = arith.constant 6 : index
    %c0_37 = arith.constant 0 : index
    %c0_38 = arith.constant 0 : index
    %42 = vector.load %arg2[%c6, %c0_37, %c0_38] : memref<9x8x8xbf16, #tpu.memory_space<vmem>>, vector<1x8x8xbf16>
    %43 = vector.shape_cast %42 : vector<1x8x8xbf16> to vector<8x8xbf16>
    %cst_39 = arith.constant dense<0.000000e+00> : vector<222x8xf32>
    %44 = tpu.matmul %41, %43, %cst_39 {dimension_numbers = #tpu.dot_dimension_numbers<[1], [0], [0], [1], [0, 0, 1, 1], [], []>} : vector<222x8xbf16>, vector<8x8xbf16>, vector<222x8xf32> -> vector<222x8xf32>
    %45 = arith.addf %39, %44 : vector<222x8xf32>
    %c0_40 = arith.constant 0 : index
    %c33 = arith.constant 33 : index
    %c0_41 = arith.constant 0 : index
    %46 = vector.load %arg1[%c0_40, %c33, %c0_41] : memref<1x256x8xbf16, #tpu.memory_space<vmem>>, vector<1x222x8xbf16>
    %47 = vector.shape_cast %46 : vector<1x222x8xbf16> to vector<222x8xbf16>
    %c7 = arith.constant 7 : index
    %c0_42 = arith.constant 0 : index
    %c0_43 = arith.constant 0 : index
    %48 = vector.load %arg2[%c7, %c0_42, %c0_43] : memref<9x8x8xbf16, #tpu.memory_space<vmem>>, vector<1x8x8xbf16>
    %49 = vector.shape_cast %48 : vector<1x8x8xbf16> to vector<8x8xbf16>
    %cst_44 = arith.constant dense<0.000000e+00> : vector<222x8xf32>
    %50 = tpu.matmul %47, %49, %cst_44 {dimension_numbers = #tpu.dot_dimension_numbers<[1], [0], [0], [1], [0, 0, 1, 1], [], []>} : vector<222x8xbf16>, vector<8x8xbf16>, vector<222x8xf32> -> vector<222x8xf32>
    %51 = arith.addf %45, %50 : vector<222x8xf32>
    %c0_45 = arith.constant 0 : index
    %c34 = arith.constant 34 : index
    %c0_46 = arith.constant 0 : index
    %52 = vector.load %arg1[%c0_45, %c34, %c0_46] : memref<1x256x8xbf16, #tpu.memory_space<vmem>>, vector<1x222x8xbf16>
    %53 = vector.shape_cast %52 : vector<1x222x8xbf16> to vector<222x8xbf16>
    %c8 = arith.constant 8 : index
    %c0_47 = arith.constant 0 : index
    %c0_48 = arith.constant 0 : index
    %54 = vector.load %arg2[%c8, %c0_47, %c0_48] : memref<9x8x8xbf16, #tpu.memory_space<vmem>>, vector<1x8x8xbf16>
    %55 = vector.shape_cast %54 : vector<1x8x8xbf16> to vector<8x8xbf16>
    %cst_49 = arith.constant dense<0.000000e+00> : vector<222x8xf32>
    %56 = tpu.matmul %53, %55, %cst_49 {dimension_numbers = #tpu.dot_dimension_numbers<[1], [0], [0], [1], [0, 0, 1, 1], [], []>} : vector<222x8xbf16>, vector<8x8xbf16>, vector<222x8xf32> -> vector<222x8xf32>
    %57 = arith.addf %51, %56 : vector<222x8xf32>
    %c0_50 = arith.constant 0 : index
    %c0_51 = arith.constant 0 : index
    %c0_52 = arith.constant 0 : index
    %58 = vector.load %arg4[%c0_50, %c0_51, %c0_52] : memref<1x222x8xf32, #tpu.memory_space<vmem>>, vector<1x222x8xf32>
    %59 = vector.shape_cast %58 : vector<1x222x8xf32> to vector<222x8xf32>
    %60 = vector.shape_cast %57 : vector<222x8xf32> to vector<1x222x8xf32>
    tpu.vector_store %arg4[%c0_50, %c0_51, %c0_52], %60 {strides = array<i32>} : memref<1x222x8xf32, #tpu.memory_space<vmem>>, vector<1x222x8xf32>,
    return
  }
  func.func @transform_0(%arg0: i32) -> (i32, i32, i32) {
    %c0_i32 = arith.constant 0 : i32
    %c0_i32_0 = arith.constant 0 : i32
    %c0_i32_1 = arith.constant 0 : i32
    return %arg0, %c0_i32, %c0_i32_0 : i32, i32, i32
  }
  func.func @transform_1(%arg0: i32) -> (i32, i32, i32) {
    %c0_i32 = arith.constant 0 : i32
    %c0_i32_0 = arith.constant 0 : i32
    %c0_i32_1 = arith.constant 0 : i32
    %c0_i32_2 = arith.constant 0 : i32
    return %c0_i32, %c0_i32_0, %c0_i32_1 : i32, i32, i32
  }
  func.func @transform_2(%arg0: i32) -> (i32, i32) {
    %c0_i32 = arith.constant 0 : i32
    %c0_i32_0 = arith.constant 0 : i32
    %c0_i32_1 = arith.constant 0 : i32
    return %c0_i32, %c0_i32_0 : i32, i32
  }
  func.func @transform_3(%arg0: i32) -> (i32, i32, i32) {
    %c0_i32 = arith.constant 0 : i32
    %c0_i32_0 = arith.constant 0 : i32
    %c0_i32_1 = arith.constant 0 : i32
    return %arg0, %c0_i32, %c0_i32_0 : i32, i32, i32
  }
}

</mosaic_0001>

<bundles_post_ra>
// kernel: tpu_custom_call.1
= control target key start
LH: loop header
LB: loop body
LE: loop exit
PB: predicated region body
PF: predicated region fallthrough
CT: control target
= control target key end

     0   :  { %s3888_s12 = smov 0   ;;  %s4675_s0 = inlined_call_operand.vmem [shape: bf16[2,256,8], index: 0, kind: input, shape index: {}]   ;;  %s4676_s1 = inlined_call_operand.vmem [shape: bf16[9,8,8], index: 1, kind: input, shape index: {}]   ;;  %s4677_s2 = inlined_call_operand.vmem [shape: f32[1,8], index: 2, kind: input, shape index: {}]   ;;  %s4678_s3 = inlined_call_operand.vmem [shape: f32[2,222,8], index: 3, kind: output, shape index: {}]  }
   0x1 LB: > { %s2940_s13 = sadd.s32 4294967295, %s3866_s12   ;;  %p2944_p0 = scmp.ge.s32.totalorder %s3866_s12, 1  ;;  %s3866_s12 = sphi %s3888_s12, %s13_s12  }
   0x2   : > { %p137_p1 = scmp.lt.s32.totalorder %s3866_s12, 3 }
   0x4   : > { %p138_p2 = pnand %p2944_p0, %p137_p1 }
   0x5   : > { %v208_v0 = vld [vmem:[%s4676_s1] sm:$0xf] (!%p138_p2)  ;;  %vm322_vm0 = vcmask (!%p138_p2), 1043456   ;;  %p161_p3 = scmp.lt.s32.totalorder (!%p138_p2), %s2940_s13, 1  ;;  %v3904_v2 = vld [vmem:[%s4676_s1 + $0x10] sm:$0xf] (!%p138_p2) }
   0x6   : > { %141 = sbr.rel (%p138_p2) target bundleno = 494 (0x1ee), region = 32  ;;  %3793 = vmatprep.subr.msk.bf16.mxu1 (!%p138_p2), %vm322_vm0, %v208_v0  ;;  %v324_v1 = vsel (!%p138_p2), %vm322_vm0, %v208_v0, 0  ;;  %3797 = vmatprep.subr.msk.bf16.mxu0 (!%p138_p2), %vm322_vm0, %v3904_v2  ;;  %v3912_v3 = vsel (!%p138_p2), %vm322_vm0, %v3904_v2, 0  ;;  %v3054_v4 = vld [vmem:[%s4676_s1 + $0x14] sm:$0xf] (!%p138_p2)  ;;  %vm279_vm1 = vcmask (!%p138_p2), 64512  }
   0x7   : > { %3270 = vmatpush3.bf16.msra.mxu1 (!%p138_p2), %v324_v1  ;;  %v2977_v5 = vld [vmem:[%s4676_s1 + $0x4] sm:$0xf] (!%p138_p2)  ;;  %3390 = vmatpush3.bf16.msra.mxu0 (!%p138_p2), %v3912_v3  ;;  %vm505_vm2 = vsmask.f32 (!%p138_p2), 7424  ;;  %v3955_v15 = vld [vmem:[%s4676_s1 + $0x8] sm:$0xf] (!%p138_p2) }
   0x8   : > { %3794 = vmatprep.subr.msk.bf16.mxu1 (!%p138_p2), %vm322_vm0, %v2977_v5  ;;  %3799 = vmatprep.subr.msk.bf16.mxu0 (!%p138_p2), %vm322_vm0, %v3054_v4  ;;  %v647_v10 = vsel (!%p138_p2), %vm322_vm0, %v2977_v5, 0  ;;  %v1790_v20 = vsel (!%p138_p2), %vm322_vm0, %v3054_v4, 0  ;;  %v3992_v35 = vld [vmem:[%s4676_s1 + $0x18] sm:$0xf] (!%p138_p2)  ;;  %vm828_vm3 = vcmask (!%p138_p2), 1046528   ;;  %vm2883_vm4 = vcmask (!%p138_p2), 62464  }
   0xd   : > { %s4680_s13 = smov (!%p161_p3, %s2940_s13), 1 }
   0xe   : > { %s3133_s22 = sshll.u32 %s4680_s13, 7  ;;  %s3803_s11 = smul.u32 224, %s4680_s13 }
   0xf   : > { %s3927_s25 = scalar_lea.vmem %s4675_s0, %s3133_s22 }
  0x10   : > { %v180_v6 = vld [vmem:[%s3927_s25] sm:$0xf]  ;;  %v3931_v7 = vld [vmem:[%s3927_s25 + $0x4] sm:$0xf]  ;;  %v3937_v9 = vld [vmem:[%s3927_s25 + $0x8] sm:$0xff]   ;;  %s4588_s16 = scalar_lea.vmem %s4678_s3, %s3803_s11 }
  0x11   : > { %v3934_v8 = vcombine.low %v180_v6, %v3931_v7  ;;  %v1074_v11 = vld [vmem:[%s3927_s25 + $0x8] sm:$0xf]  ;;  %v3942_v12 = vld [vmem:[%s3927_s25 + $0xc] sm:$0xf]  ;;  %v3950_v14 = vld [vmem:[%s3927_s25 + $0x10] sm:$0xff]  }
  0x12   : > { %v3947_v13 = vcombine.low %v1074_v11, %v3942_v12  ;;  %v3960_v16 = vld [vmem:[%s3927_s25 + $0x10] sm:$0xff]   ;;  %v1404_v19 = vshll.u32 %v3950_v14, 16  ;;  %v1408_v21 = vshrl.u32 %v3950_v14, 16  ;;  %v3970_v22 = vld [vmem:[%s3927_s25 + $0x18] sm:$0xff]   ;;  %v3978_v26 = vld [vmem:[%s3927_s25 + $0x20] sm:$0xff]  }
  0x13   : > { %3271 = vmatprep.mubr.msk.bf16.mxu1 %vm279_vm1, %v3934_v8  ;;  %v3975_v25 = vld [vmem:[%s3927_s25 + $0x18] sm:$0xff]   ;;  %v1411_v27 = vshll.u32 %v3970_v22, 16  ;;  %v1415_v28 = vshrl.u32 %v3970_v22, 16  ;;  %v1418_v31 = vshll.u32 %v3978_v26, 16  ;;  %v3984_v32 = vld [vmem:[%s3927_s25 + $0x20] sm:$0xff]   ;;  %v3987_v34 = vld [vmem:[%s3927_s25 + $0x28] sm:$0xff]  }
  0x14   : > { %3272 = vmatmul.mubr.msk.bf16.vlgmr.msra.gmra.mrb[0].mxu1 %vm279_vm1, %v3937_v9  ;;  %v1398_v17 = vshrl.u32 %v3947_v13, 16  ;;  %v1400_v18 = vshll.u32 %v3947_v13, 16  ;;  %v1406_v24 = vrot.slane %v1404_v19, 1  ;;  %v1422_v38 = vshrl.u32 %v3978_v26, 16  ;;  %v4005_v42 = vld [vmem:[%s3927_s25 + $0x30] sm:$0xff]   ;;  %v4011_v47 = vld [vmem:[%s3927_s25 + $0x28] sm:$0xff]  }
  0x15   : > { %3300 = vmatpush3.bf16.msra.mxu1 %v647_v10  ;;  %3275 = vmatprep.mubr.msk.bf16.mxu1 %vm279_vm1, %v3960_v16  ;;  %v1413_v33 = vrot.slane %v1411_v27, 1  ;;  %v1420_v37 = vrot.slane %v1418_v31, 1  ;;  %v1425_v41 = vshll.u32 %v3987_v34, 16  ;;  %v1429_v43 = vshrl.u32 %v3987_v34, 16  ;;  %v4015_v49 = vld [vmem:[%s3927_s25 + $0x38] sm:$0xff]   ;;  %v4020_v52 = vld [vmem:[%s3927_s25 + $0x30] sm:$0xff]  }
  0x16   : > { %3795 = vmatprep.subr.msk.bf16.mxu1 %vm322_vm0, %v3955_v15  ;;  %v1402_v23 = vrot.slane %v1400_v18, 1  ;;  %v1410_v30 = vor.u32 %v1408_v21, %v1406_v24  ;;  %v1432_v48 = vshll.u32 %v4005_v42, 16  ;;  %v1439_v53 = vshll.u32 %v4015_v49, 16  ;;  %v4024_v54 = vld [vmem:[%s3927_s25 + $0x40] sm:$0xff]   ;;  %v4038_v62 = vld [vmem:[%s3927_s25 + $0x48] sm:$0xff]   ;;  %v4041_v1 = vld [vmem:[%s3927_s25 + $0x38] sm:$0xff]  }
  0x17   : > { %v1417_v40 = vor.u32 %v1415_v28, %v1413_v33  ;;  %v1424_v45 = vor.u32 %v1422_v38, %v1420_v37  ;;  %v1427_v46 = vrot.slane %v1425_v41, 1  ;;  %v1436_v56 = vshrl.u32 %v4005_v42, 16  ;;  %v1714_v4 = vld [vmem:[%s3927_s25 + $0x8] sm:$0xe]  ;;  %v4045_v5 = vld [vmem:[%s3927_s25 + $0x40] sm:$0xff]  }
  0x18   : > { %v1403_v29 = vor.u32 %v1402_v23, %v1398_v17  ;;  %v1414_v39 = vsel %vm505_vm2, %v1410_v30, %v1413_v33  ;;  %v1434_v51 = vrot.slane %v1432_v48, 1  ;;  %v1443_v58 = vshrl.u32 %v4015_v49, 16  ;;  %v822_v28 = vld [vmem:[%s3927_s25] sm:$0xe]  ;;  %v207_v48 = vld [vmem:[%s3927_s25 + $0x6c] sm:$0x7] }
  0x19   : > { %v1421_v44 = vsel %vm505_vm2, %v1417_v40, %v1420_v37  ;;  %v1431_v50 = vor.u32 %v1429_v43, %v1427_v46  ;;  %v1428_v55 = vsel %vm505_vm2, %v1424_v45, %v1427_v46  ;;  %v1446_v59 = vshll.u32 %v4024_v54, 16  ;;  %v4085_v40 = vld [vmem:[%s3927_s25 + $0x58] sm:$0xff]   ;;  %v4088_v41 = vld [vmem:[%s3927_s25 + $0x60] sm:$0xff]   ;;  %v4102_v46 = vld [vmem:[%s3927_s25 + $0x68] sm:$0xf] }
  0x1a   : > { %v1407_v36 = vsel %vm505_vm2, %v1403_v29, %v1406_v24  ;;  %v1441_v60 = vrot.slane %v1439_v53, 1  ;;  %v1438_v61 = vor.u32 %v1436_v56, %v1434_v51  ;;  %v1450_v10 = vshrl.u32 %v4024_v54, 16  ;;  %v4062_v24 = vld [vmem:[%s3927_s25 + $0x48] sm:$0xff]  }
  0x1b   : > { %3391 = vmatprep.mubr.msk.bf16.mxu0 %vm279_vm1, %v1407_v36  ;;  %v1435_v57 = vsel %vm505_vm2, %v1431_v50, %v1434_v51  ;;  %v1448_v0 = vrot.slane %v1446_v59, 1  ;;  %v1453_v11 = vshll.u32 %v4038_v62, 16  ;;  %v3055_v18 = vcombine.low %v1714_v4, %v3942_v12  ;;  %v4065_v12 = vld [vmem:[%s3927_s25 + $0x50] sm:$0xff]  }
  0x1c   : > { %3276 = vmatmul.mubr.msk.bf16.gmra.mrb[4].mxu1 %vm279_vm1, %v3975_v25  ;;  %3392 = vmatmul.mubr.msk.bf16.vlgmr.msra.gmra.mrb[0].mxu0 %vm279_vm1, %v1414_v39  ;;  %v1445_v63 = vor.u32 %v1443_v58, %v1441_v60  ;;  %v1442_v6 = vsel %vm505_vm2, %v1438_v61, %v1441_v60  ;;  %v1721_v23 = vrot.slane %v3950_v14, 1  ;;  %v508_v30 = vshll.u32 %v3934_v8, 16 }
  0x1d   : > { %3279 = vmatprep.mubr.msk.bf16.mxu1 %vm279_vm1, %v3984_v32  ;;  %3420 = vmatpush3.bf16.msra.mxu0 %v1790_v20  ;;  %v1452_v19 = vor.u32 %v1450_v10, %v1448_v0  ;;  %v4058_v20 = vrot.slane %v1453_v11, 1  ;;  %v1720_v21 = vrot.slane %v3055_v18, 1  ;;  %v1723_v31 = vrot.slane %v3970_v22, 1 }
  0x1e   : > { %3395 = vmatprep.mubr.msk.bf16.mxu0 %vm279_vm1, %v1421_v44  ;;  %3800 = vmatprep.subr.msk.bf16.mxu0 %vm322_vm0, %v3992_v35  ;;  %v1449_v17 = vsel %vm505_vm2, %v1445_v63, %v1448_v0  ;;  %v506_v33 = vshrl.u32 %v3934_v8, 16  ;;  %v2994_v36 = vcombine.low %v822_v28, %v3931_v7  ;;  %v2108_v37 = vsel %vm322_vm0, %v3992_v35, 0  ;;  %v4095_v8 = vld [vmem:[%s4676_s1 + $0x1c] sm:$0xf] }
  0x1f   : > { %v1456_v27 = vsel %vm505_vm2, %v1452_v19, %v4058_v20  ;;  %v1722_v29 = vsel %vm828_vm3, %v1720_v21, %v1721_v23  ;;  %v1725_v38 = vrot.slane %v3978_v26, 1  ;;  %v510_v39 = vrot.slane %v508_v30, 1 }
  0x20   : > { %v512_v43 = vshll.u32 %v3937_v9, 16  ;;  %v1724_v44 = vsel %vm828_vm3, %v1721_v23, %v1723_v31  ;;  %v829_v7 = vrot.slane %v2994_v36, 1  ;;  %v1727_v35 = vrot.slane %v3987_v34, 1 }
  0x21   : > { %v1726_v45 = vsel %vm828_vm3, %v1723_v31, %v1725_v38  ;;  %v511_v50 = vor.u32 %v510_v39, %v506_v33  ;;  %v1729_v51 = vrot.slane %v4005_v42, 1  ;;  %v830_v56 = vrot.slane %v3937_v9, 1 }
  0x22   : > { %v514_v53 = vrot.slane %v512_v43, 1  ;;  %v523_v58 = vshrl.u32 %v3960_v16, 16  ;;  %v526_v59 = vshll.u32 %v3975_v25, 16  ;;  %v832_v60 = vrot.slane %v3960_v16, 1 }
  0x23   : > { %v4119_v61 = vsel %vm828_vm3, %v829_v7, %v830_v56  ;;  %v834_v63 = vrot.slane %v3975_v25, 1  ;;  %v1728_v0 = vsel %vm828_vm3, %v1725_v38, %v1727_v35  ;;  %v2962_v4 = vcombine.low %v4102_v46, %v207_v48 }
  0x24   : > { %3280 = vmatmul.mubr.msk.bf16.gmra.mrb[8].mxu1 %vm279_vm1, %v4011_v47  ;;  %3396 = vmatmul.mubr.msk.bf16.gmra.mrb[4].mxu0 %vm279_vm1, %v1428_v55  ;;  %v516_v55 = vshrl.u32 %v3937_v9, 16  ;;  %v836_v9 = vrot.slane %v3984_v32, 1  ;;  %v838_v11 = vrot.slane %v4011_v47, 1  ;;  %v515_v18 = vsel %vm505_vm2, %v511_v50, %v514_v53 }
  0x25   : > { %3283 = vmatprep.mubr.msk.bf16.mxu1 %vm279_vm1, %v4020_v52  ;;  %3399 = vmatprep.mubr.msk.bf16.mxu0 %vm279_vm1, %v1435_v57  ;;  %v519_v57 = vshll.u32 %v3960_v16, 16  ;;  %v4129_v10 = vsel %vm828_vm3, %v832_v60, %v834_v63  ;;  %v842_v19 = vrot.slane %v4041_v1, 1  ;;  %v844_v21 = vrot.slane %v4045_v5, 1 }
  0x26   : > { %v4132_v16 = vsel %vm828_vm3, %v834_v63, %v836_v9  ;;  %v846_v23 = vrot.slane %v4062_v24, 1  ;;  %v4142_v28 = vsel %vm828_vm3, %v836_v9, %v838_v11  ;;  %v848_v30 = vrot.slane %v4065_v12, 1 }
  0x27   : > { %v521_v31 = vrot.slane %v519_v57, 1  ;;  %v4153_v36 = vsel %vm828_vm3, %v842_v19, %v844_v21  ;;  %v518_v38 = vor.u32 %v516_v55, %v514_v53  ;;  %v1731_v43 = vrot.slane %v4015_v49, 1 }
  0x28   : > { %v4161_v39 = vsel %vm828_vm3, %v846_v23, %v848_v30  ;;  %v528_v7 = vrot.slane %v526_v59, 1  ;;  %v852_v48 = vrot.slane %v4088_v41, 1  ;;  %v533_v50 = vshll.u32 %v3984_v32, 16 }
  0x29   : > { %v522_v55 = vsel %vm505_vm2, %v518_v38, %v521_v31  ;;  %v540_v63 = vshll.u32 %v4011_v47, 16  ;;  %v551_v38 = vshrl.u32 %v4020_v52, 16 }
  0x2c   : > { %3284 = vmatmul.mubr.msk.bf16.gmra.mrb[12].mxu1 %vm279_vm1, %v4041_v1  ;;  %3400 = vmatmul.mubr.msk.bf16.gmra.mrb[8].mxu0 %vm279_vm1, %v1442_v6  ;;  %v4126_v6 = vsel %vm828_vm3, %v830_v56, %v832_v60  ;;  %v530_v56 = vshrl.u32 %v3975_v25, 16  ;;  %v537_v60 = vshrl.u32 %v3984_v32, 16  ;;  %v535_v25 = vrot.slane %v533_v50, 1 }
  0x2d   : > { %3287 = vmatprep.mubr.msk.bf16.mxu1 %vm279_vm1, %v4045_v5  ;;  %3403 = vmatprep.mubr.msk.bf16.mxu0 %vm279_vm1, %v1449_v17  ;;  %v840_v17 = vrot.slane %v4020_v52, 1 }
  0x2e   : > { %v532_v32 = vor.u32 %v530_v56, %v528_v7  ;;  %v561_v56 = vshll.u32 %v4045_v5, 16 }
  0x2f   : > { %v4150_v33 = vsel %vm828_vm3, %v840_v17, %v842_v19  ;;  %v547_v19 = vshll.u32 %v4020_v52, 16 }
  0x34   : > { %3288 = vmatmul.mubr.msk.bf16.gmra.mrb[16].mxu1 %vm279_vm1, %v4062_v24  ;;  %3404 = vmatmul.mubr.msk.bf16.gmra.mrb[12].mxu0 %vm279_vm1, %v1456_v27  ;;  %v1730_v27 = vsel %vm828_vm3, %v1727_v35, %v1729_v51  ;;  %v1733_v35 = vrot.slane %v4024_v54, 1 }
  0x35   : > { %3291 = vmatprep.mubr.msk.bf16.mxu1 %vm279_vm1, %v4065_v12  ;;  %3421 = vmatprep.mubr.msk.bf16.mxu0 %vm279_vm1, %v1722_v29  ;;  %v4145_v29 = vsel %vm828_vm3, %v838_v11, %v840_v17  ;;  %v539_v11 = vor.u32 %v537_v60, %v535_v25  ;;  %v542_v17 = vrot.slane %v540_v63, 1  ;;  %v4229_v63 = vld [vmem:[%s3927_s25 + $0x68] sm:$0xff]  }
  0x36   : > { %v1734_v9 = vsel %vm828_vm3, %v1731_v43, %v1733_v35 }
  0x3c   : > { %3292 = vmatmul.mubr.msk.bf16.gmra.mrb[20].mxu1 %vm279_vm1, %v4085_v40  ;;  %3422 = vmatmul.mubr.msk.bf16.vlgmr.msra.gmra.mrb[0].mxu0 %vm279_vm1, %v1724_v44  ;;  %v525_v44 = vor.u32 %v523_v58, %v521_v31  ;;  %v1732_v58 = vsel %vm828_vm3, %v1729_v51, %v1731_v43  ;;  %v4193_v51 = vld [vmem:[%s4676_s1 + $0xc] sm:$0xf]  ;;  %v4208_v31 = vld [vmem:[%s3927_s25 + $0x58] sm:$0xff]   ;;  %v554_v43 = vshll.u32 %v4041_v1, 16 }
  0x3d   : > { %3295 = vmatprep.mubr.msk.bf16.mxu1 %vm279_vm1, %v4088_v41  ;;  %3450 = vmatpush3.bf16.msra.mxu0 %v2108_v37  ;;  %v4156_v37 = vsel %vm828_vm3, %v844_v21, %v846_v23  ;;  %v536_v21 = vsel %vm505_vm2, %v532_v32, %v535_v25  ;;  %v544_v23 = vshrl.u32 %v4011_v47, 16  ;;  %v549_v47 = vrot.slane %v547_v19, 1  ;;  %v4241_v19 = vld [vmem:[%s3927_s25 + $0x18] sm:$0xff]  }
  0x3e   : > { %3425 = vmatprep.mubr.msk.bf16.mxu0 %vm279_vm1, %v1726_v45  ;;  %3801 = vmatprep.subr.msk.bf16.mxu0 %vm322_vm0, %v4095_v8  ;;  %v850_v45 = vrot.slane %v4085_v40, 1  ;;  %v529_v59 = vsel %vm505_vm2, %v525_v44, %v528_v7  ;;  %v4214_v7 = vld [vmem:[%s3927_s25 + $0x60] sm:$0xff]   ;;  %v1739_v52 = vrot.slane %v4208_v31, 1  ;;  %v556_v50 = vrot.slane %v554_v43, 1 }
  0x3f   : > { %v565_v32 = vshrl.u32 %v4045_v5, 16  ;;  %v1743_v5 = vrot.slane %v4229_v63, 1 }
  0x40   : > { %v4170_v53 = vsel %vm828_vm3, %v848_v30, %v850_v45  ;;  %v4177_v57 = vsel %vm828_vm3, %v850_v45, %v852_v48  ;;  %v543_v30 = vsel %vm505_vm2, %v539_v11, %v542_v17  ;;  %v546_v45 = vor.u32 %v544_v23, %v542_v17  ;;  %v1966_v23 = vld [vmem:[%s3927_s25 + $0x14] sm:$0xf] }
  0x42   : > { %v550_v60 = vsel %vm505_vm2, %v546_v45, %v549_v47 }
  0x44   : > { %3296 = vmatmul.mubr.msk.bf16.gmra.mrb[24].mxu1 %vm279_vm1, %v2962_v4  ;;  %3426 = vmatmul.mubr.msk.bf16.gmra.mrb[4].mxu0 %vm279_vm1, %v1728_v0  ;;  %v899_v0 = vsel %vm322_vm0, %v3955_v15, 0  ;;  %v4187_v4 = vld [vmem:[%s3927_s25 + $0x50] sm:$0xff]   ;;  %v1735_v15 = vrot.slane %v4038_v62, 1 }
  0x45   : > { %3301 = vmatprep.mubr.msk.bf16.mxu1 %vm279_vm1, %v515_v18  ;;  %3429 = vmatprep.mubr.msk.bf16.mxu0 %vm279_vm1, %v1730_v27  ;;  %v1737_v18 = vrot.slane %v4187_v4, 1 }
  0x46   : > { %v1736_v27 = vsel %vm828_vm3, %v1733_v35, %v1735_v15  ;;  %v553_v35 = vor.u32 %v551_v38, %v549_v47 }
  0x47   : > { %v1738_v44 = vsel %vm828_vm3, %v1735_v15, %v1737_v18  ;;  %v568_v15 = vshll.u32 %v4062_v24, 16 }
  0x48   : > { %v557_v25 = vsel %vm505_vm2, %v553_v35, %v556_v50 }
  0x49   : > { %v570_v43 = vrot.slane %v568_v15, 1  ;;  %v499_v15 = vld [vmem:[%s3927_s25 + $0x6c] sm:$0xf] }
  0x4c   : > { %3302 = vmatmul.mubr.msk.bf16.vlgmr.msra.gmra.mrb[0].mxu1 %vm279_vm1, %v522_v55  ;;  %3430 = vmatmul.mubr.msk.bf16.gmra.mrb[8].mxu0 %vm279_vm1, %v1732_v58  ;;  %v1741_v55 = vrot.slane %v4214_v7, 1  ;;  %v4224_v58 = vld [vmem:[%s3927_s25 + $0x70] sm:$0xf] }
  0x4d   : > { %3305 = vmatprep.mubr.msk.bf16.mxu1 %vm279_vm1, %v529_v59  ;;  %3433 = vmatprep.mubr.msk.bf16.mxu0 %vm279_vm1, %v1734_v9  ;;  %v1392_v59 = vld [vmem:[%s3927_s25 + $0x74] sm:$0xf]  ;;  %v558_v9 = vshrl.u32 %v4041_v1, 16  ;;  %v4245_v1 = vld [vmem:[%s3927_s25 + $0x20] sm:$0xff]  }
  0x4e   : > { %3330 = vmatpush3.bf16.msra.mxu1 %v899_v0  ;;  %v1740_v0 = vsel %vm828_vm3, %v1737_v18, %v1739_v52  ;;  %v1742_v11 = vsel %vm828_vm3, %v1739_v52, %v1741_v55  ;;  %v4238_v17 = vcombine.low %v4224_v58, %v1392_v59  ;;  %v2614_v47 = vrot.slane %v4245_v1, 1 }
  0x4f   : > { %3796 = vmatprep.subr.msk.bf16.mxu1 %vm322_vm0, %v4193_v51  ;;  %v560_v18 = vor.u32 %v558_v9, %v556_v50  ;;  %v575_v52 = vshll.u32 %v4065_v12, 16 }
  0x50   : > { %v1745_v45 = vrot.slane %v4238_v17, 1 }
  0x54   : > { %3306 = vmatmul.mubr.msk.bf16.gmra.mrb[4].mxu1 %vm279_vm1, %v536_v21  ;;  %3434 = vmatmul.mubr.msk.bf16.gmra.mrb[12].mxu0 %vm279_vm1, %v1736_v27  ;;  %v563_v21 = vrot.slane %v561_v56, 1  ;;  %v2605_v27 = vld [vmem:[%s3927_s25 + $0x10] sm:$0xe]  ;;  %v1744_v56 = vsel %vm828_vm3, %v1741_v55, %v1743_v5  ;;  %v577_v55 = vrot.slane %v575_v52, 1 }
  0x55   : > { %3309 = vmatprep.mubr.msk.bf16.mxu1 %vm279_vm1, %v543_v30  ;;  %3437 = vmatprep.mubr.msk.bf16.mxu0 %vm279_vm1, %v1738_v44  ;;  %v2612_v30 = vrot.slane %v4241_v19, 1  ;;  %v3116_v44 = vcombine.low %v2605_v27, %v1966_v23  ;;  %v4272_v27 = vld [vmem:[%s3927_s25 + $0x28] sm:$0xff]  }
  0x56   : > { %v567_v38 = vor.u32 %v565_v32, %v563_v21  ;;  %v564_v59 = vsel %vm505_vm2, %v560_v18, %v563_v21  ;;  %v4276_v21 = vld [vmem:[%s3927_s25 + $0x30] sm:$0xff]   ;;  %v4282_v18 = vcombine.low %v4102_v46, %v499_v15  ;;  %v586_v46 = vshrl.u32 %v4085_v40, 16  ;;  %v4306_v15 = vld [vmem:[%s3927_s25 + $0x40] sm:$0xff]  }
  0x57   : > { %v2611_v35 = vrot.slane %v3116_v44, 1  ;;  %v4258_v50 = vsel %vm828_vm3, %v2612_v30, %v2614_v47  ;;  %v1965_v44 = vld [vmem:[%s3927_s25 + $0x10] sm:$0xf] }
  0x58   : > { %v571_v9 = vsel %vm505_vm2, %v567_v38, %v570_v43  ;;  %v2618_v38 = vrot.slane %v4276_v21, 1 }
  0x59   : > { %v4267_v32 = vsel %vm828_vm3, %v2611_v35, %v2612_v30  ;;  %v589_v35 = vshll.u32 %v4088_v41, 16 }
  0x5c   : > { %3310 = vmatmul.mubr.msk.bf16.gmra.mrb[8].mxu1 %vm279_vm1, %v550_v60  ;;  %3438 = vmatmul.mubr.msk.bf16.gmra.mrb[16].mxu0 %vm279_vm1, %v1740_v0  ;;  %v572_v60 = vshrl.u32 %v4062_v24, 16  ;;  %v579_v0 = vshrl.u32 %v4065_v12, 16  ;;  %v2616_v12 = vrot.slane %v4272_v27, 1 }
  0x5d   : > { %3313 = vmatprep.mubr.msk.bf16.mxu1 %vm279_vm1, %v557_v25  ;;  %3441 = vmatprep.mubr.msk.bf16.mxu0 %vm279_vm1, %v1742_v11  ;;  %v582_v25 = vshll.u32 %v4085_v40, 16  ;;  %v1746_v11 = vsel %vm828_vm3, %v1743_v5, %v1745_v45 }
  0x5e   : > { %v574_v24 = vor.u32 %v572_v60, %v570_v43  ;;  %v581_v5 = vor.u32 %v579_v0, %v577_v55  ;;  %v4288_v52 = vsel %vm828_vm3, %v2614_v47, %v2616_v12  ;;  %v4292_v43 = vsel %vm828_vm3, %v2616_v12, %v2618_v38 }
  0x5f   : > { %v584_v30 = vrot.slane %v582_v25, 1  ;;  %v597_v0 = vshll.u32 %v4282_v18, 16  ;;  %v4302_v25 = vld [vmem:[%s3927_s25 + $0x38] sm:$0xff]   ;;  %v591_v47 = vrot.slane %v589_v35, 1  ;;  %v4325_v35 = vld [vmem:[%s3927_s25 + $0x48] sm:$0xff]  }
  0x61   : > { %v585_v60 = vsel %vm505_vm2, %v581_v5, %v584_v30  ;;  %v588_v40 = vor.u32 %v586_v46, %v584_v30  ;;  %v2430_v30 = vsel %vm322_vm0, %v4095_v8, 0  ;;  %v4330_v46 = vld [vmem:[%s3927_s25 + $0x50] sm:$0xff]   ;;  %v2624_v8 = vrot.slane %v4325_v35, 1 }
  0x64   : > { %3314 = vmatmul.mubr.msk.bf16.gmra.mrb[12].mxu1 %vm279_vm1, %v564_v59  ;;  %3442 = vmatmul.mubr.msk.bf16.gmra.mrb[20].mxu0 %vm279_vm1, %v1744_v56  ;;  %v578_v56 = vsel %vm505_vm2, %v574_v24, %v577_v55  ;;  %v4296_v59 = vcombine.low %v1965_v44, %v1966_v23  ;;  %v2620_v23 = vrot.slane %v4302_v25, 1  ;;  %v599_v55 = vrot.slane %v597_v0, 1 }
  0x65   : > { %3317 = vmatprep.mubr.msk.bf16.mxu1 %vm279_vm1, %v571_v9  ;;  %3445 = vmatprep.mubr.msk.bf16.mxu0 %vm279_vm1, %v1746_v11  ;;  %v593_v9 = vshrl.u32 %v4088_v41, 16  ;;  %v2622_v24 = vrot.slane %v4306_v15, 1 }
  0x66   : > { %v4315_v12 = vsel %vm828_vm3, %v2618_v38, %v2620_v23  ;;  %v4335_v38 = vld [vmem:[%s4676_s1 + $0x20] sm:$0xf] }
  0x67   : > { %v595_v11 = vor.u32 %v593_v9, %v591_v47  ;;  %v4318_v5 = vsel %vm828_vm3, %v2620_v23, %v2622_v24  ;;  %v4347_v9 = vsel %vm828_vm3, %v2622_v24, %v2624_v8  ;;  %v1992_v23 = vld [vmem:[%s3927_s25 + $0x7c] sm:$0x7]  ;;  %v2302_v24 = vshll.u32 %v4245_v1, 16 }
  0x69   : > { %v600_v44 = vsel %vm505_vm2, %v595_v11, %v599_v55 }
  0x6c   : > { %3318 = vmatmul.mubr.msk.bf16.gmra.mrb[16].mxu1 %vm279_vm1, %v578_v56  ;;  %3446 = vmatmul.mubr.msk.bf16.gmra.mrb[24].mxu0 %vm279_vm1, %v1745_v45  ;;  %v592_v45 = vsel %vm505_vm2, %v588_v40, %v591_v47  ;;  %v601_v56 = vshrl.u32 %v4282_v18, 16  ;;  %v1217_v40 = vsel %vm322_vm0, %v4193_v51, 0 }
  0x6d   : > { %3321 = vmatprep.mubr.msk.bf16.mxu1 %vm279_vm1, %v585_v60  ;;  %3451 = vmatprep.mubr.msk.bf16.mxu0 %vm279_vm1, %v4296_v59  ;;  %v2626_v60 = vrot.slane %v4330_v46, 1 }
  0x6e   : > { %v603_v0 = vor.u32 %v601_v56, %v599_v55 }
  0x6f   : > { %v4352_v47 = vsel %vm828_vm3, %v2624_v8, %v2626_v60 }
  0x74   : > { %3322 = vmatmul.mubr.msk.bf16.gmra.mrb[20].mxu1 %vm279_vm1, %v592_v45  ;;  %3452 = vmatmul.mubr.msk.bf16.vlgmr.msra.gmra.mrb[0].mxu0 %vm279_vm1, %v4241_v19 }
  0x75   : > { %3325 = vmatprep.mubr.msk.bf16.mxu1 %vm279_vm1, %v600_v44  ;;  %3480 = vmatpush3.bf16.msra.mxu0 %v2430_v30  ;;  %v2306_v44 = vshrl.u32 %v4245_v1, 16  ;;  %v2304_v30 = vrot.slane %v2302_v24, 1 }
  0x76   : > { %3455 = vmatprep.mubr.msk.bf16.mxu0 %vm279_vm1, %v4245_v1  ;;  %3802 = vmatprep.subr.msk.bf16.mxu0 %vm322_vm0, %v4335_v38  ;;  %v2316_v1 = vshll.u32 %v4276_v21, 16 }
  0x77   : > { %v2308_v8 = vor.u32 %v2306_v44, %v2304_v30 }
  0x78   : > { %v2318_v41 = vrot.slane %v2316_v1, 1 }
  0x7c   : > { %3326 = vmatmul.mubr.msk.bf16.gmra.mrb[24].mxu1 %vm279_vm1, %v603_v0  ;;  %3456 = vmatmul.mubr.msk.bf16.gmra.mrb[4].mxu0 %vm279_vm1, %v4272_v27 }
  0x7d   : > { %3331 = vmatprep.mubr.msk.bf16.mxu1 %vm279_vm1, %v4119_v61  ;;  %3459 = vmatprep.mubr.msk.bf16.mxu0 %vm279_vm1, %v4276_v21  ;;  %v4382_v61 = vld [vmem:[%s3927_s25 + $0x58] sm:$0xff]  }
  0x84   : > { %3332 = vmatmul.mubr.msk.bf16.vlgmr.msra.gmra.mrb[0].mxu1 %vm279_vm1, %v4126_v6  ;;  %3460 = vmatmul.mubr.msk.bf16.gmra.mrb[8].mxu0 %vm279_vm1, %v4302_v25  ;;  %v4385_v6 = vld [vmem:[%s3927_s25 + $0x60] sm:$0xff]  }
  0x85   : > { %3335 = vmatprep.mubr.msk.bf16.mxu1 %vm279_vm1, %v4129_v10  ;;  %3463 = vmatprep.mubr.msk.bf16.mxu0 %vm279_vm1, %v4306_v15  ;;  %v4397_v10 = vld [vmem:[%s3927_s25 + $0x68] sm:$0xff]  }
  0x86   : > { %3360 = vmatpush3.bf16.msra.mxu1 %v1217_v40 }
  0x87   : > { %3798 = vmatprep.subr.msk.bf16.mxu1 %vm322_vm0, %v3904_v2  ;;  %v2291_v2 = vshll.u32 %v4296_v59, 16 }
  0x89   : > { %v2293_v51 = vrot.slane %v2291_v2, 1  ;;  %v2313_v2 = vshrl.u32 %v4272_v27, 16 }
  0x8c   : > { %3336 = vmatmul.mubr.msk.bf16.gmra.mrb[4].mxu1 %vm279_vm1, %v4132_v16  ;;  %3464 = vmatmul.mubr.msk.bf16.gmra.mrb[12].mxu0 %vm279_vm1, %v4325_v35  ;;  %v4400_v16 = vld [vmem:[%s3927_s25 + $0x70] sm:$0xff]  }
  0x8d   : > { %3339 = vmatprep.mubr.msk.bf16.mxu1 %vm279_vm1, %v4142_v28  ;;  %3467 = vmatprep.mubr.msk.bf16.mxu0 %vm279_vm1, %v4330_v46  ;;  %v2289_v28 = vshrl.u32 %v4296_v59, 16 }
  0x8f   : > { %v2294_v11 = vor.u32 %v2293_v51, %v2289_v28  ;;  %v2320_v51 = vshrl.u32 %v4276_v21, 16 }
  0x94   : > { %3340 = vmatmul.mubr.msk.bf16.gmra.mrb[8].mxu1 %vm279_vm1, %v4145_v29  ;;  %3468 = vmatmul.mubr.msk.bf16.gmra.mrb[16].mxu0 %vm279_vm1, %v4382_v61  ;;  %v2295_v29 = vshll.u32 %v4241_v19, 16 }
  0x95   : > { %3343 = vmatprep.mubr.msk.bf16.mxu1 %vm279_vm1, %v4150_v33  ;;  %3471 = vmatprep.mubr.msk.bf16.mxu0 %vm279_vm1, %v4385_v6  ;;  %v4413_v33 = vld [vmem:[%s3927_s25 + $0x78] sm:$0xf] }
  0x96   : > { %v2297_v59 = vrot.slane %v2295_v29, 1  ;;  %v3084_v55 = vcombine.low %v4413_v33, %v1992_v23  ;;  %v2330_v29 = vshll.u32 %v4306_v15, 16  ;;  %v2327_v23 = vshrl.u32 %v4302_v25, 16 }
  0x98   : > { %v2298_v45 = vsel %vm505_vm2, %v2294_v11, %v2297_v59 }
  0x9c   : > { %3344 = vmatmul.mubr.msk.bf16.gmra.mrb[12].mxu1 %vm279_vm1, %v4153_v36  ;;  %3472 = vmatmul.mubr.msk.bf16.gmra.mrb[20].mxu0 %vm279_vm1, %v4397_v10  ;;  %v2299_v36 = vshrl.u32 %v4241_v19, 16  ;;  %v854_v19 = vrot.slane %v4282_v18, 1  ;;  %v2323_v18 = vshll.u32 %v4302_v25, 16  ;;  %v2344_v25 = vshll.u32 %v4330_v46, 16 }
  0x9d   : > { %3347 = vmatprep.mubr.msk.bf16.mxu1 %vm279_vm1, %v4156_v37  ;;  %3475 = vmatprep.mubr.msk.bf16.mxu0 %vm279_vm1, %v4400_v16  ;;  %v2309_v37 = vshll.u32 %v4272_v27, 16  ;;  %v2322_v27 = vor.u32 %v2320_v51, %v2318_v41 }
  0x9e   : > { %v2301_v56 = vor.u32 %v2299_v36, %v2297_v59  ;;  %v2337_v59 = vshll.u32 %v4325_v35, 16 }
  0x9f   : > { %v2311_v0 = vrot.slane %v2309_v37, 1 }
  0xa0   : > { %v2305_v40 = vsel %vm505_vm2, %v2301_v56, %v2304_v30  ;;  %v2348_v30 = vshrl.u32 %v4330_v46, 16  ;;  %v2351_v56 = vshll.u32 %v4382_v61, 16 }
  0xa1   : > { %v2312_v28 = vsel %vm505_vm2, %v2308_v8, %v2311_v0 }
  0xa2   : > { %v2353_v8 = vrot.slane %v2351_v56, 1  ;;  %v1485_v56 = vshrl.u32 %v4229_v63, 16 }
  0xa4   : > { %3348 = vmatmul.mubr.msk.bf16.gmra.mrb[16].mxu1 %vm279_vm1, %v4161_v39  ;;  %3476 = vmatmul.mubr.msk.bf16.gmra.mrb[24].mxu0 %vm279_vm1, %v3084_v55  ;;  %v855_v39 = vsel %vm828_vm3, %v852_v48, %v854_v19  ;;  %v2315_v48 = vor.u32 %v2313_v2, %v2311_v0  ;;  %v2332_v55 = vrot.slane %v2330_v29, 1  ;;  %v2358_v0 = vshll.u32 %v4385_v6, 16  ;;  %v2283_v2 = vld [vmem:[%s3927_s25 + $0x7c] sm:$0xf] }
  0xa5   : > { %3351 = vmatprep.mubr.msk.bf16.mxu1 %vm279_vm1, %v4170_v53  ;;  %3481 = vmatprep.mubr.msk.bf16.mxu0 %vm279_vm1, %v2298_v45  ;;  %v2681_v53 = vsel %vm322_vm0, %v4335_v38, 0  ;;  %v2325_v38 = vrot.slane %v2323_v18, 1  ;;  %v2339_v45 = vrot.slane %v2337_v59, 1  ;;  %v1460_v59 = vshll.u32 %v4187_v4, 16 }
  0xa6   : > { %v2319_v21 = vsel %vm505_vm2, %v2315_v48, %v2318_v41  ;;  %v2372_v41 = vshll.u32 %v4400_v16, 16 }
  0xa7   : > { %v2326_v11 = vsel %vm505_vm2, %v2322_v27, %v2325_v38  ;;  %v2329_v24 = vor.u32 %v2327_v23, %v2325_v38  ;;  %v2376_v38 = vshrl.u32 %v4400_v16, 16 }
  0xa9   : > { %v2333_v44 = vsel %vm505_vm2, %v2329_v24, %v2332_v55 }
  0xac   : > { %3352 = vmatmul.mubr.msk.bf16.gmra.mrb[20].mxu1 %vm279_vm1, %v4177_v57  ;;  %3482 = vmatmul.mubr.msk.bf16.vlgmr.msra.gmra.mrb[0].mxu0 %vm279_vm1, %v2305_v40  ;;  %v2334_v57 = vshrl.u32 %v4306_v15, 16  ;;  %v2341_v15 = vshrl.u32 %v4325_v35, 16  ;;  %v2355_v40 = vshrl.u32 %v4382_v61, 16 }
  0xad   : > { %3355 = vmatprep.mubr.msk.bf16.mxu1 %vm279_vm1, %v855_v39  ;;  %3510 = vmatpush3.bf16.msra.mxu0 %v2681_v53  ;;  %v2362_v39 = vshrl.u32 %v4385_v6, 16 }
  0xae   : > { %3485 = vmatprep.mubr.msk.bf16.mxu0 %vm279_vm1, %v2312_v28  ;;  %v2336_v36 = vor.u32 %v2334_v57, %v2332_v55  ;;  %v2357_v53 = vor.u32 %v2355_v40, %v2353_v8  ;;  %v4483_v28 = vcombine.low %v4413_v33, %v2283_v2  ;;  %v2374_v33 = vrot.slane %v2372_v41, 1  ;;  %v1101_v55 = vld [vmem:[%s3927_s25 + $0x74] sm:$0x7] }
  0xb0   : > { %v2340_v37 = vsel %vm505_vm2, %v2336_v36, %v2339_v45  ;;  %v1467_v36 = vshll.u32 %v4208_v31, 16 }
  0xb4   : > { %3356 = vmatmul.mubr.msk.bf16.gmra.mrb[24].mxu1 %vm279_vm1, %v854_v19  ;;  %3486 = vmatmul.mubr.msk.bf16.gmra.mrb[4].mxu0 %vm279_vm1, %v2319_v21  ;;  %v2343_v19 = vor.u32 %v2341_v15, %v2339_v45  ;;  %v2378_v21 = vor.u32 %v2376_v38, %v2374_v33  ;;  %v1464_v45 = vshrl.u32 %v4187_v4, 16  ;;  %v1469_v15 = vrot.slane %v1467_v36, 1 }
  0xb5   : > { %3361 = vmatprep.mubr.msk.bf16.mxu1 %vm279_vm1, %v3947_v13  ;;  %3489 = vmatprep.mubr.msk.bf16.mxu0 %vm279_vm1, %v2326_v11  ;;  %v2346_v13 = vrot.slane %v2344_v25, 1 }
  0xb7   : > { %v2350_v35 = vor.u32 %v2348_v30, %v2346_v13  ;;  %v2347_v1 = vsel %vm505_vm2, %v2343_v19, %v2346_v13 }
  0xbc   : > { %3362 = vmatmul.mubr.msk.bf16.vlgmr.msra.gmra.mrb[0].mxu1 %vm279_vm1, %v3950_v14  ;;  %3490 = vmatmul.mubr.msk.bf16.gmra.mrb[8].mxu0 %vm279_vm1, %v2333_v44  ;;  %v2354_v14 = vsel %vm505_vm2, %v2350_v35, %v2353_v8  ;;  %v1474_v44 = vshll.u32 %v4214_v7, 16  ;;  %v2628_v35 = vrot.slane %v4382_v61, 1  ;;  %v2632_v61 = vrot.slane %v4397_v10, 1 }
  0xbd   : > { %3365 = vmatprep.mubr.msk.bf16.mxu1 %vm279_vm1, %v3970_v22  ;;  %3493 = vmatprep.mubr.msk.bf16.mxu0 %vm279_vm1, %v2340_v37  ;;  %v2365_v22 = vshll.u32 %v4397_v10, 16  ;;  %v1478_v37 = vshrl.u32 %v4214_v7, 16 }
  0xbe   : > { %3540 = vmatpush3.bf16.msra.mxu1 %v3912_v3  ;;  %v2360_v3 = vrot.slane %v2358_v0, 1  ;;  %v2629_v0 = vsel %vm828_vm3, %v2626_v60, %v2628_v35 }
  0xbf   : > { %v2367_v18 = vrot.slane %v2365_v22, 1 }
  0xc0   : > { %v2364_v51 = vor.u32 %v2362_v39, %v2360_v3  ;;  %v2361_v48 = vsel %vm505_vm2, %v2357_v53, %v2360_v3 }
  0xc2   : > { %v2368_v27 = vsel %vm505_vm2, %v2364_v51, %v2367_v18 }
  0xc4   : > { %3366 = vmatmul.mubr.msk.bf16.gmra.mrb[4].mxu1 %vm279_vm1, %v3978_v26  ;;  %3494 = vmatmul.mubr.msk.bf16.gmra.mrb[12].mxu0 %vm279_vm1, %v2347_v1  ;;  %v2369_v26 = vshrl.u32 %v4397_v10, 16 }
  0xc5   : > { %3369 = vmatprep.mubr.msk.bf16.mxu1 %vm279_vm1, %v3987_v34  ;;  %3497 = vmatprep.mubr.msk.bf16.mxu0 %vm279_vm1, %v2354_v14  ;;  %v2380_v34 = vshll.u32 %v4483_v28, 16 }
  0xc6   : > { %v2371_v29 = vor.u32 %v2369_v26, %v2367_v18 }
  0xc7   : > { %v2382_v23 = vrot.slane %v2380_v34, 1  ;;  %v4580_v34 = vld [vmem:[%s4677_s2] ss:$0 sm:$0xff] }
  0xc8   : > { %v2375_v11 = vsel %vm505_vm2, %v2371_v29, %v2374_v33 }
  0xc9   : > { %v2383_v57 = vsel %vm505_vm2, %v2378_v21, %v2382_v23 }
  0xcc   : > { %3370 = vmatmul.mubr.msk.bf16.gmra.mrb[8].mxu1 %vm279_vm1, %v4005_v42  ;;  %3498 = vmatmul.mubr.msk.bf16.gmra.mrb[16].mxu0 %vm279_vm1, %v2361_v48  ;;  %v2384_v42 = vshrl.u32 %v4483_v28, 16 }
  0xcd   : > { %3373 = vmatprep.mubr.msk.bf16.mxu1 %vm279_vm1, %v4015_v49  ;;  %3501 = vmatprep.mubr.msk.bf16.mxu0 %vm279_vm1, %v2368_v27 }
  0xce   : > { %v2386_v49 = vor.u32 %v2384_v42, %v2382_v23 }
  0xd4   : > { %3374 = vmatmul.mubr.msk.bf16.gmra.mrb[12].mxu1 %vm279_vm1, %v4024_v54  ;;  %3502 = vmatmul.mubr.msk.bf16.gmra.mrb[20].mxu0 %vm279_vm1, %v2375_v11  ;;  %v1457_v54 = vshrl.u32 %v4038_v62, 16 }
  0xd5   : > { %3377 = vmatprep.mubr.msk.bf16.mxu1 %vm279_vm1, %v4038_v62  ;;  %3505 = vmatprep.mubr.msk.bf16.mxu0 %vm279_vm1, %v2383_v57  ;;  %v3023_v62 = vcombine.low %v4224_v58, %v1101_v55 }
  0xd6   : > { %v1459_v24 = vor.u32 %v1457_v54, %v4058_v20 }
  0xdc   : > { %3378 = vmatmul.mubr.msk.bf16.gmra.mrb[16].mxu1 %vm279_vm1, %v4187_v4  ;;  %3506 = vmatmul.mubr.msk.bf16.gmra.mrb[24].mxu0 %vm279_vm1, %v2386_v49  ;;  %v1476_v4 = vrot.slane %v1474_v44, 1 }
  0xdd   : > { %3381 = vmatprep.mubr.msk.bf16.mxu1 %vm279_vm1, %v4208_v31  ;;  %3511 = vmatprep.mubr.msk.bf16.mxu0 %vm279_vm1, %v4267_v32  ;;  %v1462_v32 = vrot.slane %v1460_v59, 1 }
  0xdf   : > { %v1463_v25 = vsel %vm505_vm2, %v1459_v24, %v1462_v32  ;;  %v1466_v20 = vor.u32 %v1464_v45, %v1462_v32 }
  0xe4   : > { %3382 = vmatmul.mubr.msk.bf16.gmra.mrb[20].mxu1 %vm279_vm1, %v4214_v7  ;;  %3512 = vmatmul.mubr.msk.bf16.vlgmr.msra.gmra.mrb[0].mxu0 %vm279_vm1, %v4258_v50  ;;  %v1471_v50 = vshrl.u32 %v4208_v31, 16  ;;  %v1470_v31 = vsel %vm505_vm2, %v1466_v20, %v1469_v15 }
  0xe5   : > { %3385 = vmatprep.mubr.msk.bf16.mxu1 %vm279_vm1, %v4229_v63  ;;  %3515 = vmatprep.mubr.msk.bf16.mxu0 %vm279_vm1, %v4288_v52  ;;  %v1481_v52 = vshll.u32 %v4229_v63, 16 }
  0xe6   : > { %v1473_v58 = vor.u32 %v1471_v50, %v1469_v15 }
  0xe7   : > { %v1483_v13 = vrot.slane %v1481_v52, 1 }
  0xe8   : > { %v1477_v30 = vsel %vm505_vm2, %v1473_v58, %v1476_v4 }
  0xe9   : > { %v1487_v19 = vor.u32 %v1485_v56, %v1483_v13 }
  0xec   : > { %3386 = vmatmul.mubr.msk.bf16.gmra.mrb[24].mxu1 %vm279_vm1, %v3023_v62  ;;  %3516 = vmatmul.mubr.msk.bf16.gmra.mrb[4].mxu0 %vm279_vm1, %v4292_v43  ;;  %v1489_v43 = vshll.u32 %v4238_v17, 16 }
  0xed   : > { %3407 = vmatprep.mubr.msk.bf16.mxu1 %vm279_vm1, %v1463_v25  ;;  %3519 = vmatprep.mubr.msk.bf16.mxu0 %vm279_vm1, %v4315_v12  ;;  %v1480_v12 = vor.u32 %v1478_v37, %v1476_v4 }
  0xee   : > { %v1491_v7 = vrot.slane %v1489_v43, 1 }
  0xef   : > { %v1484_v63 = vsel %vm505_vm2, %v1480_v12, %v1483_v13 }
  0xf0   : > { %v1492_v8 = vsel %vm505_vm2, %v1487_v19, %v1491_v7 }
  0xf4   : > { %3408 = vmatmul.mubr.msk.bf16.vlgmr.msra.gmra.mrb[16].mxu1 %vm279_vm1, %v1470_v31  ;;  %3520 = vmatmul.mubr.msk.bf16.gmra.mrb[8].mxu0 %vm279_vm1, %v4318_v5  ;;  %v1493_v5 = vshrl.u32 %v4238_v17, 16  ;;  %v2634_v17 = vrot.slane %v4400_v16, 1 }
  0xf5   : > { %3411 = vmatprep.mubr.msk.bf16.mxu1 %vm279_vm1, %v1477_v30  ;;  %3523 = vmatprep.mubr.msk.bf16.mxu0 %vm279_vm1, %v4347_v9  ;;  %v2630_v9 = vrot.slane %v4385_v6, 1 }
  0xf6   : > { %v1495_v1 = vor.u32 %v1493_v5, %v1491_v7  ;;  %v2635_v40 = vsel %vm828_vm3, %v2632_v61, %v2634_v17 }
  0xf7   : > { %v2631_v46 = vsel %vm828_vm3, %v2628_v35, %v2630_v9  ;;  %v2633_v60 = vsel %vm828_vm3, %v2630_v9, %v2632_v61 }
  0xfc   : > { %3412 = vmatmul.mubr.msk.bf16.gmra.mrb[20].mxu1 %vm279_vm1, %v1484_v63  ;;  %3524 = vmatmul.mubr.msk.bf16.gmra.mrb[12].mxu0 %vm279_vm1, %v4352_v47  ;;  %v2636_v47 = vrot.slane %v4483_v28, 1 }
  0xfd   : > { %3415 = vmatprep.mubr.msk.bf16.mxu1 %vm279_vm1, %v1492_v8  ;;  %3527 = vmatprep.mubr.msk.bf16.mxu0 %vm279_vm1, %v2629_v0 }
  0xfe   : > { %v2637_v6 = vsel %vm828_vm3, %v2634_v17, %v2636_v47 }
 0x104   : > { %3416 = vmatmul.mubr.msk.bf16.gmra.mrb[24].mxu1 %vm279_vm1, %v1495_v1  ;;  %3528 = vmatmul.mubr.msk.bf16.gmra.mrb[16].mxu0 %vm279_vm1, %v2631_v46 }
 0x105   : > { %3531 = vmatprep.mubr.msk.bf16.mxu0 %vm279_vm1, %v2633_v60 }
 0x10c   : > { %3532 = vmatmul.mubr.msk.bf16.gmra.mrb[20].mxu0 %vm279_vm1, %v2635_v40 }
 0x10d   : > { %3535 = vmatprep.mubr.msk.bf16.mxu0 %vm279_vm1, %v2637_v6 }
 0x114   : > { %3536 = vmatmul.mubr.msk.bf16.gmra.mrb[24].mxu0 %vm279_vm1, %v2636_v47 }
 0x18f   : > { %v3363_v10 = vpop.f32.mrb[0].mxu1 }
 0x190   : > { %v1253_v14 = vpop.f32.mrb[1].mxu1  ;;  %v3541_v33 = vadd.f32 %v3363_v10, %v4580_v34 }
 0x191   : > { %v3364_v39 = vpop.f32.mrb[2].mxu1  ;;  %v3543_v29 = vadd.f32 %v4580_v34, %v1253_v14 }
 0x192   : > { %v1256_v22 = vpop.f32.mrb[3].mxu1  ;;  %v3545_v23 = vadd.f32 %v3364_v39, %v4580_v34 }
 0x193   : > { %v3547_v42 = vadd.f32 %v4580_v34, %v1256_v22 }
 0x197   : > { %v3367_v2 = vpop.f32.mrb[4].mxu1 }
 0x198   : > { %v1269_v3 = vpop.f32.mrb[5].mxu1  ;;  %v3549_v32 = vadd.f32 %v3367_v2, %v4580_v34 }
 0x199   : > { %v3368_v16 = vpop.f32.mrb[6].mxu1  ;;  %v3551_v62 = vadd.f32 %v4580_v34, %v1269_v3 }
 0x19a   : > { %v1272_v53 = vpop.f32.mrb[7].mxu1  ;;  %v3553_v45 = vadd.f32 %v3368_v16, %v4580_v34 }
 0x19b   : > { %v3555_v44 = vadd.f32 %v4580_v34, %v1272_v53 }
 0x19f   : > { %v3371_v28 = vpop.f32.mrb[8].mxu1 }
 0x1a0   : > { %v1285_v51 = vpop.f32.mrb[9].mxu1  ;;  %v3557_v31 = vadd.f32 %v3371_v28, %v4580_v34 }
 0x1a1   : > { %v3372_v18 = vpop.f32.mrb[10].mxu1  ;;  %v3559_v30 = vadd.f32 %v4580_v34, %v1285_v51 }
 0x1a2   : > { %v1288_v41 = vpop.f32.mrb[11].mxu1  ;;  %v3561_v13 = vadd.f32 %v3372_v18, %v4580_v34 }
 0x1a3   : > { %v3563_v35 = vadd.f32 %v4580_v34, %v1288_v41 }
 0x1a7   : > { %v3375_v48 = vpop.f32.mrb[12].mxu1 }
 0x1a8   : > { %v1301_v26 = vpop.f32.mrb[13].mxu1  ;;  %v3565_v1 = vadd.f32 %v3375_v48, %v4580_v34 }
 0x1a9   : > { %v3376_v27 = vpop.f32.mrb[14].mxu1  ;;  %v3567_v60 = vadd.f32 %v4580_v34, %v1301_v26 }
 0x1aa   : > { %v4575_v38 = vpop.f32.mrb[15].mxu1  ;;  %v3569_v40 = vadd.f32 %v3376_v27, %v4580_v34 }
 0x1ab   : > { %v3571_v39 = vadd.f32 %v4580_v34, %v4575_v38 }
 0x1b7   : > { %v3513_v21 = vpop.f32.mrb[0].mxu0 }
 0x1b8   : > { %v3542_v11 = vadd.f32 %v3541_v33, %v3513_v21  ;;  %v2717_v57 = vpop.f32.mrb[1].mxu0 }
 0x1b9   : > { %v3544_v49 = vadd.f32 %v3543_v29, %v2717_v57  ;;  %v3514_v54 = vpop.f32.mrb[2].mxu0 }
 0x1ba   : > { %2858 = vst.msk [vmem:[%s4588_s16 + $0x10] sm:$0xff] %vm279_vm1, %v3542_v11  ;;  %v3546_v59 = vadd.f32 %v3545_v23, %v3514_v54  ;;  %v2720_v55 = vpop.f32.mrb[3].mxu0 }
 0x1bb   : > { %2856 = vst.msk [vmem:[%s4588_s16] sm:$0xff] %vm279_vm1, %v3544_v49  ;;  %v3548_v24 = vadd.f32 %v3547_v42, %v2720_v55 }
 0x1bc   : > { %2859 = vst.msk [vmem:[%s4588_s16 + $0x18] sm:$0xff] %vm279_vm1, %v3546_v59 }
 0x1bd   : > { %2857 = vst.msk [vmem:[%s4588_s16 + $0x8] sm:$0xff] %vm279_vm1, %v3548_v24 }
 0x1bf   : > { %v3517_v36 = vpop.f32.mrb[4].mxu0 }
 0x1c0   : > { %v3550_v25 = vadd.f32 %v3549_v32, %v3517_v36  ;;  %v2733_v50 = vpop.f32.mrb[5].mxu0 }
 0x1c1   : > { %v3552_v15 = vadd.f32 %v3551_v62, %v2733_v50  ;;  %v3518_v20 = vpop.f32.mrb[6].mxu0 }
 0x1c2   : > { %2862 = vst.msk [vmem:[%s4588_s16 + $0x30] sm:$0xff] %vm279_vm1, %v3550_v25  ;;  %v3554_v58 = vadd.f32 %v3553_v45, %v3518_v20  ;;  %v2736_v4 = vpop.f32.mrb[7].mxu0 }
 0x1c3   : > { %2860 = vst.msk [vmem:[%s4588_s16 + $0x20] sm:$0xff] %vm279_vm1, %v3552_v15  ;;  %v3556_v52 = vadd.f32 %v3555_v44, %v2736_v4 }
 0x1c4   : > { %2863 = vst.msk [vmem:[%s4588_s16 + $0x38] sm:$0xff] %vm279_vm1, %v3554_v58 }
 0x1c5   : > { %2861 = vst.msk [vmem:[%s4588_s16 + $0x28] sm:$0xff] %vm279_vm1, %v3556_v52 }
 0x1c7   : > { %v3409_v37 = vpop.f32.mrb[16].mxu1  ;;  %v3521_v56 = vpop.f32.mrb[8].mxu0 }
 0x1c8   : > { %v1639_v43 = vpop.f32.mrb[17].mxu1  ;;  %v3558_v12 = vadd.f32 %v3557_v31, %v3521_v56  ;;  %v2749_v19 = vpop.f32.mrb[9].mxu0  ;;  %v3573_v51 = vadd.f32 %v3409_v37, %v4580_v34 }
 0x1c9   : > { %v3410_v7 = vpop.f32.mrb[18].mxu1  ;;  %v3560_v63 = vadd.f32 %v3559_v30, %v2749_v19  ;;  %v3522_v8 = vpop.f32.mrb[10].mxu0  ;;  %v3575_v41 = vadd.f32 %v4580_v34, %v1639_v43 }
 0x1ca   : > { %v1642_v0 = vpop.f32.mrb[19].mxu1  ;;  %2866 = vst.msk [vmem:[%s4588_s16 + $0x50] sm:$0xff] %vm279_vm1, %v3558_v12  ;;  %v3562_v5 = vadd.f32 %v3561_v13, %v3522_v8  ;;  %v2752_v9 = vpop.f32.mrb[11].mxu0  ;;  %v3577_v27 = vadd.f32 %v3410_v7, %v4580_v34 }
 0x1cb   : > { %2864 = vst.msk [vmem:[%s4588_s16 + $0x40] sm:$0xff] %vm279_vm1, %v3560_v63  ;;  %v3564_v61 = vadd.f32 %v3563_v35, %v2752_v9  ;;  %v3579_v21 = vadd.f32 %v4580_v34, %v1642_v0 }
 0x1cc   : > { %2867 = vst.msk [vmem:[%s4588_s16 + $0x58] sm:$0xff] %vm279_vm1, %v3562_v5 }
 0x1cd   : > { %2865 = vst.msk [vmem:[%s4588_s16 + $0x48] sm:$0xff] %vm279_vm1, %v3564_v61 }
 0x1cf   : > { %v3413_v46 = vpop.f32.mrb[20].mxu1  ;;  %v3525_v17 = vpop.f32.mrb[12].mxu0 }
 0x1d0   : > { %v1655_v47 = vpop.f32.mrb[21].mxu1  ;;  %v3566_v6 = vadd.f32 %v3565_v1, %v3525_v17  ;;  %v2765_v10 = vpop.f32.mrb[13].mxu0  ;;  %v3581_v59 = vadd.f32 %v3413_v46, %v4580_v34 }
 0x1d1   : > { %v3414_v14 = vpop.f32.mrb[22].mxu1  ;;  %v3568_v22 = vadd.f32 %v3567_v60, %v2765_v10  ;;  %v3526_v2 = vpop.f32.mrb[14].mxu0  ;;  %v3583_v55 = vadd.f32 %v4580_v34, %v1655_v47 }
 0x1d2   : > { %v1658_v3 = vpop.f32.mrb[23].mxu1  ;;  %2870 = vst.msk [vmem:[%s4588_s16 + $0x70] sm:$0xff] %vm279_vm1, %v3566_v6  ;;  %v3570_v16 = vadd.f32 %v3569_v40, %v3526_v2  ;;  %v2768_v53 = vpop.f32.mrb[15].mxu0  ;;  %v3585_v32 = vadd.f32 %v3414_v14, %v4580_v34 }
 0x1d3   : > { %2868 = vst.msk [vmem:[%s4588_s16 + $0x60] sm:$0xff] %vm279_vm1, %v3568_v22  ;;  %v3572_v28 = vadd.f32 %v3571_v39, %v2768_v53  ;;  %v3587_v45 = vadd.f32 %v4580_v34, %v1658_v3 }
 0x1d4   : > { %2871 = vst.msk [vmem:[%s4588_s16 + $0x78] sm:$0xff] %vm279_vm1, %v3570_v16 }
 0x1d5   : > { %2869 = vst.msk [vmem:[%s4588_s16 + $0x68] sm:$0xff] %vm279_vm1, %v3572_v28 }
 0x1d7   : > { %v3417_v18 = vpop.f32.mrb[24].mxu1  ;;  %v3529_v48 = vpop.f32.mrb[16].mxu0 }
 0x1d8   : > { %v1671_v26 = vpop.f32.mrb[25].mxu1  ;;  %v3574_v38 = vadd.f32 %v3573_v51, %v3529_v48  ;;  %v2781_v33 = vpop.f32.mrb[17].mxu0  ;;  %v3589_v58 = vadd.f32 %v3417_v18, %v4580_v34 }
 0x1d9   : > { %v3418_v29 = vpop.f32.mrb[26].mxu1  ;;  %v3576_v23 = vadd.f32 %v3575_v41, %v2781_v33  ;;  %v3530_v11 = vpop.f32.mrb[18].mxu0  ;;  %v3591_v4 = vadd.f32 %v4580_v34, %v1671_v26 }
 0x1da   : > { %v1674_v57 = vpop.f32.mrb[27].mxu1  ;;  %2874 = vst.msk [vmem:[%s4588_s16 + $0x90] sm:$0xff] %vm279_vm1, %v3574_v38  ;;  %v3578_v42 = vadd.f32 %v3577_v27, %v3530_v11  ;;  %v2784_v49 = vpop.f32.mrb[19].mxu0  ;;  %v3593_v31 = vadd.f32 %v3418_v29, %v4580_v34 }
 0x1db   : > { %2872 = vst.msk [vmem:[%s4588_s16 + $0x80] sm:$0xff] %vm279_vm1, %v3576_v23  ;;  %v3580_v54 = vadd.f32 %v3579_v21, %v2784_v49  ;;  %v3595_v56 = vadd.f32 %v4580_v34, %v1674_v57 }
 0x1dc   : > { %2875 = vst.msk [vmem:[%s4588_s16 + $0x98] sm:$0xff] %vm279_vm1, %v3578_v42 }
 0x1dd   : > { %2873 = vst.msk [vmem:[%s4588_s16 + $0x88] sm:$0xff] %vm279_vm1, %v3580_v54 }
 0x1df   : > { %v3533_v24 = vpop.f32.mrb[20].mxu0 }
 0x1e0   : > { %v3582_v62 = vadd.f32 %v3581_v59, %v3533_v24  ;;  %v2797_v36 = vpop.f32.mrb[21].mxu0 }
 0x1e1   : > { %v3584_v25 = vadd.f32 %v3583_v55, %v2797_v36  ;;  %v3534_v50 = vpop.f32.mrb[22].mxu0 }
 0x1e2   : > { %2878 = vst.msk [vmem:[%s4588_s16 + $0xb0] sm:$0xff] %vm279_vm1, %v3582_v62  ;;  %v3586_v44 = vadd.f32 %v3585_v32, %v3534_v50  ;;  %v2800_v15 = vpop.f32.mrb[23].mxu0 }
 0x1e3   : > { %2876 = vst.msk [vmem:[%s4588_s16 + $0xa0] sm:$0xff] %vm279_vm1, %v3584_v25  ;;  %v3588_v20 = vadd.f32 %v3587_v45, %v2800_v15 }
 0x1e4   : > { %2879 = vst.msk [vmem:[%s4588_s16 + $0xb8] sm:$0xff] %vm279_vm1, %v3586_v44 }
 0x1e5   : > { %2877 = vst.msk [vmem:[%s4588_s16 + $0xa8] sm:$0xff] %vm279_vm1, %v3588_v20 }
 0x1e7   : > { %v3537_v52 = vpop.f32.mrb[24].mxu0 }
 0x1e8   : > { %v3590_v37 = vadd.f32 %v3589_v58, %v3537_v52  ;;  %v2813_v30 = vpop.f32.mrb[25].mxu0 }
 0x1e9   : > { %v3592_v43 = vadd.f32 %v3591_v4, %v2813_v30  ;;  %v3538_v13 = vpop.f32.mrb[26].mxu0 }
 0x1ea   : > { %2882 = vst.msk [vmem:[%s4588_s16 + $0xd0] sm:$0xff] %vm279_vm1, %v3590_v37  ;;  %v3594_v12 = vadd.f32 %v3593_v31, %v3538_v13  ;;  %v2816_v19 = vpop.f32.mrb[27].mxu0 }
 0x1eb   : > { %2880 = vst.msk [vmem:[%s4588_s16 + $0xc0] sm:$0xff] %vm279_vm1, %v3592_v43  ;;  %v3596_v7 = vadd.f32 %v3595_v56, %v2816_v19 }
 0x1ec   : > { %2884 = vst.msk [vmem:[%s4588_s16 + $0xd8] sm:$0x3f] %vm2883_vm4, %v3594_v12 }
 0x1ed   : > { %2881 = vst.msk [vmem:[%s4588_s16 + $0xc8] sm:$0xff] %vm279_vm1, %v3596_v7 }
 0x1ee PF: > { %s13_s12 = sadd.s32 1, %s3866_s12  }
 0x1ef   : > { %p10_p4 = scmp.ge.s32.totalorder %s13_s12, 4  }
 0x1f1   :  { %12 = sbr.rel (!%p10_p4) target bundleno = 1 (0x1), region = 70 }

</bundles_post_ra>
